<compile_context>
chip_gen: v6e
topology: v6e:2x2x1
jax: 0.10.0
libtpu: 0.0.40
codegen_flags: <defaults>
</compile_context>

<pallas_src>
import functools

import jax
import jax.numpy as jnp
from jax.experimental import pallas as pl
from jax.experimental.pallas import tpu as pltpu


_LANES = 128
_SUBLANES = 8
# Per-VMEM-buffer budget.  Pallas double-buffers input and output blocks
# (4 buffers total), so 2 MiB/buffer -> <= 8 MiB scoped VMEM: comfortably
# inside v5e's 16 MiB default scoped limit and far under v7x's 64 MiB VMEM.
_BUDGET_PER_BUF_BYTES = 2 * 1024 * 1024


def _copy_kernel(z_ref, o_ref):
    # Identity copy of the current (tr, cols) tile.
    o_ref[...] = z_ref[...]


def unflatter_reference(zs: jax.Array, h_dim: int) -> jax.Array:
    """Metadata-only equivalent of torch .view(B, h_dim, 1, 1) (preferred)."""
    return zs.reshape(zs.shape[0], h_dim, 1, 1)


@functools.partial(jax.jit, static_argnames=("h_dim",))
def unflatter(zs: jax.Array, h_dim: int) -> jax.Array:
    """Pallas equivalent of UnFlatter(h_dim).forward(zs).

    zs: (B, h_dim) array.  Returns (B, h_dim, 1, 1), same dtype.
    """
    B, H = zs.shape
    assert H == h_dim, f"expected last dim {h_dim}, got {H}"
    dtype = zs.dtype
    itemsize = jnp.dtype(dtype).itemsize
    total = B * H

    # Lane-dense presentation: view the flat latent as a (rows, 128) slab so
    # every vector store uses all 128 lanes.  Fall back to (B, H) full-extent
    # blocks (always legal) when the element count is not a multiple of 128.
    if total % _LANES == 0 and total >= _LANES:
        flat2d = zs.reshape(total // _LANES, _LANES)
    else:
        flat2d = zs
    rows, cols = flat2d.shape

    # Largest row tile fitting the per-buffer VMEM budget; single grid step
    # (whole array in one block) whenever it fits.
    tr = min(rows, max(1, _BUDGET_PER_BUF_BYTES // (cols * itemsize)))
    if tr < rows:
        # Partial tiling -> sublane dim must be a multiple of 8.
        tr = max(_SUBLANES, tr - tr % _SUBLANES)
    grid_steps = pl.cdiv(rows, tr)

    flat_out = pl.pallas_call(
        _copy_kernel,
        out_shape=jax.ShapeDtypeStruct((rows, cols), dtype),
        grid=(grid_steps,),
        in_specs=[pl.BlockSpec((tr, cols), lambda i: (i, 0))],
        out_specs=pl.BlockSpec((tr, cols), lambda i: (i, 0)),
        # Output aliases the input buffer: the HBM write side disappears.
        input_output_aliases={0: 0},
        compiler_params=pltpu.CompilerParams(
            dimension_semantics=(
                ("parallel",) if grid_steps > 1 else ("arbitrary",)
            ),
        ),
    )(flat2d)

    # Glue: singleton spatial dims (NCHW), identical to torch .view().
    return flat_out.reshape(B, h_dim, 1, 1)


if __name__ == "__main__":
    key = jax.random.PRNGKey(0)

    # Path 1: small latent, B*h_dim not a multiple of 128 -> full-block copy.
    B, h_dim = 2, 32
    zs = jax.random.normal(key, (B, h_dim), dtype=jnp.float32)
    out = jax.block_until_ready(unflatter(zs, h_dim))
    ref = unflatter_reference(zs, h_dim)
    assert out.shape == (B, h_dim, 1, 1), out.shape
    assert out.dtype == zs.dtype
    assert jnp.array_equal(out, ref)

    # Path 2: lane-dense slab path (B*h_dim is a multiple of 128).
    B2, h2 = 4, 64
    zs2 = jax.random.normal(jax.random.PRNGKey(0), (B2, h2), dtype=jnp.float32)
    out2 = jax.block_until_ready(unflatter(zs2, h2))
    assert out2.shape == (B2, h2, 1, 1)
    assert jnp.array_equal(out2, zs2.reshape(B2, h2, 1, 1))

    print("KERNEL_OK")
</pallas_src>

<mosaic_0001>
module attributes {stable_mosaic.version = 11 : i64} {
  func.func @_copy_kernel(%arg0: i32, %arg1: memref<2x32xf32, #tpu.memory_space<vmem>>, %arg2: memref<2x32xf32, #tpu.memory_space<vmem>>) attributes {dimension_semantics = [#tpu.dimension_semantics<arbitrary>], iteration_bounds = array<i64: 1>, scalar_prefetch = 0 : i64, scratch_operands = 0 : i64, tpu.core_type = #tpu.core_type<tc>, window_params = [{transform_indices = @transform_0, window_bounds = array<i64: 2, 32>}, {transform_indices = @transform_1, window_bounds = array<i64: 2, 32>}]} {
    %c0 = arith.constant 0 : index
    %c0_0 = arith.constant 0 : index
    %0 = vector.load %arg1[%c0, %c0_0] : memref<2x32xf32, #tpu.memory_space<vmem>>, vector<2x32xf32>
    %c0_1 = arith.constant 0 : index
    %c0_2 = arith.constant 0 : index
    %1 = vector.load %arg2[%c0_1, %c0_2] : memref<2x32xf32, #tpu.memory_space<vmem>>, vector<2x32xf32>
    tpu.vector_store %arg2[%c0_1, %c0_2], %0 {strides = array<i32>} : memref<2x32xf32, #tpu.memory_space<vmem>>, vector<2x32xf32>,
    return
  }
  func.func @transform_0(%arg0: i32) -> (i32, i32) {
    %c0_i32 = arith.constant 0 : i32
    %c0_i32_0 = arith.constant 0 : i32
    return %arg0, %c0_i32 : i32, i32
  }
  func.func @transform_1(%arg0: i32) -> (i32, i32) {
    %c0_i32 = arith.constant 0 : i32
    %c0_i32_0 = arith.constant 0 : i32
    return %arg0, %c0_i32 : i32, i32
  }
}

</mosaic_0001>

<bundles_post_ra>
// kernel: unflatter.1
= control target key start
LH: loop header
LB: loop body
LE: loop exit
PB: predicated region body
PF: predicated region fallthrough
CT: control target
= control target key end

     0   :  { %vm9_vm0 = vcmask 254976   ;;  %s31_s0 = inlined_call_operand.vmem [shape: f32[2,32], index: 0, kind: input, shape index: {}, may-alias: {0,1}]   ;;  %s32_s1 = inlined_call_operand.vmem [shape: f32[2,32], index: 1, kind: output, shape index: {}, may-alias: {0,1}]  }
   0x1   :  { %v8_v0 = vld [vmem:[%s31_s0] sm:$0x3] }
   0x2   :  { %10 = vst.msk [vmem:[%s32_s1] sm:$0x3] %vm9_vm0, %v8_v0 }

</bundles_post_ra>
